<compile_context>
chip_gen: v7x
topology: tpu7x:2x2x1
jax: 0.10.0
libtpu: 0.0.40
codegen_flags: <defaults>
</compile_context>

<pallas_src>
import jax
import jax.numpy as jnp
from jax.experimental import pallas as pl
from jax.experimental.pallas import tpu as pltpu

D_IN = 10000    # nn.Linear(10000, 100)
D_HID = 100
D_OUT = 1000    # nn.Linear(100, 1000)

# Lane-aligned padded dims.
D_IN_P = 10240   # 80 * 128, divisible by TK
D_HID_P = 128
D_OUT_P = 1024

TK = 2048                 # reduction tile over D_IN
K_STEPS = D_IN_P // TK    # 5


def _round_up(x, m):
    return ((x + m - 1) // m) * m


def _mlp_kernel(x_ref, w1_ref, b1_ref, w2_ref, b2_ref, o_ref, h_acc):
    """One (TM batch-tile, TK reduction-chunk) grid step of out = (x@W1+b1)@W2+b2."""
    k = pl.program_id(1)

    @pl.when(k == 0)
    def _():
        h_acc[...] = jnp.zeros_like(h_acc)

    # Partial first linear: (TM, TK) @ (TK, D_HID_P), f32 accumulate.
    h_acc[...] += jnp.dot(
        x_ref[...],
        w1_ref[...].astype(jnp.float32),
        preferred_element_type=jnp.float32,
    )

    @pl.when(k == pl.num_programs(1) - 1)
    def _():
        h = h_acc[...] + b1_ref[...]
        out = jnp.dot(
            h,
            w2_ref[...].astype(jnp.float32),
            preferred_element_type=jnp.float32,
        )
        o_ref[...] = (out + b2_ref[...]).astype(o_ref.dtype)


def linear_nn_forward(x, w1, b1, w2, b2):
    """x: (B, 1, D_IN) f32; w1: (D_IN, D_HID) bf16; b1: (D_HID,) f32;
       w2: (D_HID, D_OUT) bf16; b2: (D_OUT,) f32  ->  (B, 1, D_OUT) f32."""
    B = x.shape[0]

    # Batch tile: up to 256 (MXU-shaped, and "parallel" for v7x dual-TC); small
    # batches get a single sublane-aligned tile.
    TM = min(256, _round_up(max(B, 1), 8))
    B_pad = _round_up(B, TM)

    # Zero-pad everything to lane/sublane-aligned shapes (padding is mathematically
    # inert: extra x cols are zero, extra w1 rows/cols are zero, extra w2 rows are
    # zero, and extra output cols are sliced off).
    x2d = x.reshape(B, D_IN)
    x_p = jnp.zeros((B_pad, D_IN_P), jnp.float32).at[:B, :D_IN].set(x2d)
    w1_p = jnp.zeros((D_IN_P, D_HID_P), jnp.bfloat16).at[:D_IN, :D_HID].set(w1)
    b1_p = jnp.zeros((1, D_HID_P), jnp.float32).at[0, :D_HID].set(b1)
    w2_p = jnp.zeros((D_HID_P, D_OUT_P), jnp.bfloat16).at[:D_HID, :D_OUT].set(w2)
    b2_p = jnp.zeros((1, D_OUT_P), jnp.float32).at[0, :D_OUT].set(b2)

    grid = (B_pad // TM, K_STEPS)

    # TODO(synk): if the real input is the one-hot eye(10000) from the PyTorch
    # script, the first matmul should be replaced by a scalar-prefetch row-gather
    # of w1 (PrefetchScalarGridSpec + pl.Element) instead of a dense matmul.
    out_p = pl.pallas_call(
        _mlp_kernel,
        out_shape=jax.ShapeDtypeStruct((B_pad, D_OUT_P), jnp.float32),
        grid_spec=pltpu.PrefetchScalarGridSpec(
            num_scalar_prefetch=0,
            grid=grid,
            in_specs=[
                pl.BlockSpec((TM, TK), lambda m, k: (m, k)),          # x chunk
                pl.BlockSpec((TK, D_HID_P), lambda m, k: (k, 0)),     # w1 chunk (bf16)
                pl.BlockSpec((1, D_HID_P), lambda m, k: (0, 0)),      # b1
                pl.BlockSpec((D_HID_P, D_OUT_P), lambda m, k: (0, 0)),  # w2 (bf16)
                pl.BlockSpec((1, D_OUT_P), lambda m, k: (0, 0)),      # b2
            ],
            out_specs=pl.BlockSpec((TM, D_OUT_P), lambda m, k: (m, 0)),
            scratch_shapes=[pltpu.VMEM((TM, D_HID_P), jnp.float32)],
        ),
        compiler_params=pltpu.CompilerParams(
            dimension_semantics=("parallel", "arbitrary"),
        ),
    )(x_p, w1_p, b1_p, w2_p, b2_p)

    return out_p[:B, :D_OUT].reshape(B, 1, D_OUT)


def init_params(key):
    """Deterministic init mimicking nn.Linear default U(-1/sqrt(fan_in), 1/sqrt(fan_in)).
    Weights are stored transposed (in, out) and in bfloat16; biases stay f32."""
    k1, k2, k3, k4 = jax.random.split(key, 4)
    bound1 = 1.0 / jnp.sqrt(jnp.float32(D_IN))
    bound2 = 1.0 / jnp.sqrt(jnp.float32(D_HID))
    w1 = jax.random.uniform(k1, (D_IN, D_HID), jnp.float32, -bound1, bound1)
    b1 = jax.random.uniform(k2, (D_HID,), jnp.float32, -bound1, bound1)
    w2 = jax.random.uniform(k3, (D_HID, D_OUT), jnp.float32, -bound2, bound2)
    b2 = jax.random.uniform(k4, (D_OUT,), jnp.float32, -bound2, bound2)
    return w1.astype(jnp.bfloat16), b1, w2.astype(jnp.bfloat16), b2


if __name__ == "__main__":
    key = jax.random.PRNGKey(0)
    k_params, k_x = jax.random.split(key)

    w1, b1, w2, b2 = init_params(k_params)

    # Small batch demo (the original script uses B=10000 one-hot rows; semantics
    # are identical per-row).
    B = 8
    x = jax.random.normal(k_x, (B, 1, D_IN), jnp.float32)

    out = linear_nn_forward(x, w1, b1, w2, b2)
    out = jax.block_until_ready(out)

    # Reference in plain JAX using the same bf16-rounded weights upcast to f32.
    w1f = w1.astype(jnp.float32)
    w2f = w2.astype(jnp.float32)
    ref = (x.reshape(B, D_IN) @ w1f + b1) @ w2f + b2
    ref = ref.reshape(B, 1, D_OUT)

    assert out.shape == (B, 1, D_OUT)
    assert jnp.allclose(out, ref, atol=1e-3, rtol=1e-3)

    print("KERNEL_OK")
</pallas_src>

<mosaic_0001>
module attributes {stable_mosaic.version = 11 : i64} {
  func.func @_mlp_kernel(%arg0: i32, %arg1: i32, %arg2: memref<8x2048xf32, #tpu.memory_space<vmem>>, %arg3: memref<2048x128xbf16, #tpu.memory_space<vmem>>, %arg4: memref<1x128xf32, #tpu.memory_space<vmem>>, %arg5: memref<128x1024xbf16, #tpu.memory_space<vmem>>, %arg6: memref<1x1024xf32, #tpu.memory_space<vmem>>, %arg7: memref<8x1024xf32, #tpu.memory_space<vmem>>, %arg8: memref<8x128xf32, #tpu.memory_space<vmem>>) attributes {dimension_semantics = [#tpu.dimension_semantics<parallel>, #tpu.dimension_semantics<arbitrary>], iteration_bounds = array<i64: 1, 5>, scalar_prefetch = 0 : i64, scratch_operands = 1 : i64, tpu.core_type = #tpu.core_type<tc>, window_params = [{transform_indices = @transform_0, window_bounds = array<i64: 8, 2048>}, {transform_indices = @transform_1, window_bounds = array<i64: 2048, 128>}, {pipeline_mode = #tpu.pipeline_mode<synchronous>, transform_indices = @transform_2, window_bounds = array<i64: 1, 128>}, {pipeline_mode = #tpu.pipeline_mode<synchronous>, transform_indices = @transform_3, window_bounds = array<i64: 128, 1024>}, {pipeline_mode = #tpu.pipeline_mode<synchronous>, transform_indices = @transform_4, window_bounds = array<i64: 1, 1024>}, {transform_indices = @transform_5, window_bounds = array<i64: 8, 1024>}]} {
    %c0_i32 = arith.constant 0 : i32
    %0 = arith.cmpi eq, %arg1, %c0_i32 : i32
    %1 = arith.extui %0 : i1 to i32
    %c0_i32_0 = arith.constant 0 : i32
    %2 = arith.cmpi ne, %1, %c0_i32_0 : i32
    scf.if %2 {
      %cst_9 = arith.constant 0.000000e+00 : f32
      %13 = vector.broadcast %cst_9 : f32 to vector<8x128xf32>
      %c0_10 = arith.constant 0 : index
      %c0_11 = arith.constant 0 : index
      %14 = vector.load %arg8[%c0_10, %c0_11] : memref<8x128xf32, #tpu.memory_space<vmem>>, vector<8x128xf32>
      tpu.vector_store %arg8[%c0_10, %c0_11], %13 {strides = array<i32>} : memref<8x128xf32, #tpu.memory_space<vmem>>, vector<8x128xf32>,
    } else {
    }
    %c0 = arith.constant 0 : index
    %c0_1 = arith.constant 0 : index
    %3 = vector.load %arg8[%c0, %c0_1] : memref<8x128xf32, #tpu.memory_space<vmem>>, vector<8x128xf32>
    %c0_2 = arith.constant 0 : index
    %c0_3 = arith.constant 0 : index
    %4 = vector.load %arg2[%c0_2, %c0_3] : memref<8x2048xf32, #tpu.memory_space<vmem>>, vector<8x2048xf32>
    %c0_4 = arith.constant 0 : index
    %c0_5 = arith.constant 0 : index
    %5 = vector.load %arg3[%c0_4, %c0_5] : memref<2048x128xbf16, #tpu.memory_space<vmem>>, vector<2048x128xbf16>
    %6 = arith.extf %5 : vector<2048x128xbf16> to vector<2048x128xf32>
    %cst = arith.constant dense<0.000000e+00> : vector<8x128xf32>
    %7 = tpu.matmul %4, %6, %cst {dimension_numbers = #tpu.dot_dimension_numbers<[1], [0], [0], [1], [0, 0, 1, 1], [], []>} : vector<8x2048xf32>, vector<2048x128xf32>, vector<8x128xf32> -> vector<8x128xf32>
    %8 = arith.addf %3, %7 : vector<8x128xf32>
    %c0_6 = arith.constant 0 : index
    %c0_7 = arith.constant 0 : index
    %9 = vector.load %arg8[%c0_6, %c0_7] : memref<8x128xf32, #tpu.memory_space<vmem>>, vector<8x128xf32>
    tpu.vector_store %arg8[%c0_6, %c0_7], %8 {strides = array<i32>} : memref<8x128xf32, #tpu.memory_space<vmem>>, vector<8x128xf32>,
    %c4_i32 = arith.constant 4 : i32
    %10 = arith.cmpi eq, %arg1, %c4_i32 : i32
    %11 = arith.extui %10 : i1 to i32
    %c0_i32_8 = arith.constant 0 : i32
    %12 = arith.cmpi ne, %11, %c0_i32_8 : i32
    scf.if %12 {
      %c0_9 = arith.constant 0 : index
      %c0_10 = arith.constant 0 : index
      %13 = vector.load %arg8[%c0_9, %c0_10] : memref<8x128xf32, #tpu.memory_space<vmem>>, vector<8x128xf32>
      %c0_11 = arith.constant 0 : index
      %c0_12 = arith.constant 0 : index
      %14 = vector.load %arg4[%c0_11, %c0_12] : memref<1x128xf32, #tpu.memory_space<vmem>>, vector<1x128xf32>
      %15 = vector.broadcast %14 : vector<1x128xf32> to vector<8x128xf32>
      %16 = arith.addf %13, %15 : vector<8x128xf32>
      %c0_13 = arith.constant 0 : index
      %c0_14 = arith.constant 0 : index
      %17 = vector.load %arg5[%c0_13, %c0_14] : memref<128x1024xbf16, #tpu.memory_space<vmem>>, vector<128x1024xbf16>
      %18 = arith.extf %17 : vector<128x1024xbf16> to vector<128x1024xf32>
      %cst_15 = arith.constant dense<0.000000e+00> : vector<8x1024xf32>
      %19 = tpu.matmul %16, %18, %cst_15 {dimension_numbers = #tpu.dot_dimension_numbers<[1], [0], [0], [1], [0, 0, 1, 1], [], []>} : vector<8x128xf32>, vector<128x1024xf32>, vector<8x1024xf32> -> vector<8x1024xf32>
      %c0_16 = arith.constant 0 : index
      %c0_17 = arith.constant 0 : index
      %20 = vector.load %arg6[%c0_16, %c0_17] : memref<1x1024xf32, #tpu.memory_space<vmem>>, vector<1x1024xf32>
      %21 = vector.broadcast %20 : vector<1x1024xf32> to vector<8x1024xf32>
      %22 = arith.addf %19, %21 : vector<8x1024xf32>
      %c0_18 = arith.constant 0 : index
      %c0_19 = arith.constant 0 : index
      %23 = vector.load %arg7[%c0_18, %c0_19] : memref<8x1024xf32, #tpu.memory_space<vmem>>, vector<8x1024xf32>
      tpu.vector_store %arg7[%c0_18, %c0_19], %22 {strides = array<i32>} : memref<8x1024xf32, #tpu.memory_space<vmem>>, vector<8x1024xf32>,
    } else {
    }
    return
  }
  func.func @transform_0(%arg0: i32, %arg1: i32) -> (i32, i32) {
    %c0_i32 = arith.constant 0 : i32
    return %arg0, %arg1 : i32, i32
  }
  func.func @transform_1(%arg0: i32, %arg1: i32) -> (i32, i32) {
    %c0_i32 = arith.constant 0 : i32
    %c0_i32_0 = arith.constant 0 : i32
    return %arg1, %c0_i32 : i32, i32
  }
  func.func @transform_2(%arg0: i32, %arg1: i32) -> (i32, i32) {
    %c0_i32 = arith.constant 0 : i32
    %c0_i32_0 = arith.constant 0 : i32
    %c0_i32_1 = arith.constant 0 : i32
    return %c0_i32, %c0_i32_0 : i32, i32
  }
  func.func @transform_3(%arg0: i32, %arg1: i32) -> (i32, i32) {
    %c0_i32 = arith.constant 0 : i32
    %c0_i32_0 = arith.constant 0 : i32
    %c0_i32_1 = arith.constant 0 : i32
    return %c0_i32, %c0_i32_0 : i32, i32
  }
  func.func @transform_4(%arg0: i32, %arg1: i32) -> (i32, i32) {
    %c0_i32 = arith.constant 0 : i32
    %c0_i32_0 = arith.constant 0 : i32
    %c0_i32_1 = arith.constant 0 : i32
    return %c0_i32, %c0_i32_0 : i32, i32
  }
  func.func @transform_5(%arg0: i32, %arg1: i32) -> (i32, i32) {
    %c0_i32 = arith.constant 0 : i32
    %c0_i32_0 = arith.constant 0 : i32
    return %arg0, %c0_i32 : i32, i32
  }
}

</mosaic_0001>

<bundles_post_ra>
// kernel: tpu_custom_call.1
= control target key start
LH: loop header
LB: loop body
LE: loop exit
PB: predicated region body
PF: predicated region fallthrough
CT: control target
= control target key end

     0   :  { %10 = vsyncpa [#allocation4], 0  ;;  %s4313_s0 = inlined_call_operand.hbm [shape: f32[8,10240], index: 0, kind: input, shape index: {}]   ;;  %s4314_s1 = inlined_call_operand.hbm [shape: bf16[10240,128], index: 1, kind: input, shape index: {}]   ;;  %s4315_s2 = inlined_call_operand.hbm [shape: f32[1,128], index: 2, kind: input, shape index: {}]   ;;  %s4316_s3 = inlined_call_operand.hbm [shape: bf16[128,1024], index: 3, kind: input, shape index: {}]   ;;  %s4317_s4 = inlined_call_operand.hbm [shape: f32[1,1024], index: 4, kind: input, shape index: {}]   ;;  %s4318_s5 = inlined_call_operand.hbm [shape: f32[8,1024], index: 5, kind: output, shape index: {}]  }
   0x1   :  { %12 = vsyncpa [#allocation4 + $0x1], 0 }
   0x2   :  { %13 = vsyncpa [#allocation7], 0 }
   0x3   :  { %15 = vsyncpa [#allocation7 + $0x1], 0 }
   0x4   :  { %16 = vsyncpa [#allocation10], 0 }
   0x5   :  { %17 = vsyncpa [#allocation5], 0  ;;  %s3869_s18 = smov 0   ;;  %s3871_s19 = smov 0  }
   0x6   :  { %s3873_s20 = smov 0   ;;  %s3875_s21 = smov 0  }
   0x7   :  { %s3877_s22 = smov 0   ;;  %s3879_s23 = smov 0  }
   0x8 LB: > { %s3898_s24 = sadd.s32 4294967295, %s3825_s23   ;;  %p57_p0 = scmp.ne.s32.totalorder %s3809_s19, %s3805_s18  ;;  %s3825_s23 = sphi %s3879_s23, %s23_s23   ;;  %s3821_s22 = sphi %s3877_s22, %s4337_s22   ;;  %s3817_s21 = sphi %s3875_s21, %s4336_s21   ;;  %s3813_s20 = sphi %s3873_s20, %s4335_s20   ;;  %s3809_s19 = sphi %s3871_s19, %s4334_s19   ;;  %s3805_s18 = sphi %s3869_s18, %s4333_s18  }
   0x9   : > { %p4319_p1 = scmp.eq.s32.totalorder %s3898_s24, 0  ;;  %p2092_p2 = scmp.ge.s32.totalorder %s3825_s23, 1 }
   0xa   : > { %p183_p3 = scmp.lt.s32.totalorder %s3825_s23, 6  ;;  %s3827_s27 = smov [#allocation8]  }
   0xb   : > { %p3906_p4 = por %p4319_p1, %p57_p0  ;;  %s196_s28 = sshll.u32 %s3827_s27, 4  ;;  %s197_s28 = int_to_ptr.vmem [resolvable:$true] %s196_s28 }
   0xc   : > { %p3910_p5 = pnand %p2092_p2, %p183_p3  ;;  %s3828_s29 = smov [#allocation9]  }
   0xd   : > { %s4322_s25 = scalar_select %p3906_p4, 1, 0 }
   0xe   : > { %s4323_s26 = scalar_select %p3910_p5, 1, 0 }
   0xf   : > { %p3505_p6 = pneg %p3910_p5  ;;  %s206_s30 = sshll.u32 %s3828_s29, 4  ;;  %s3922_s30 = int_to_ptr.vmem [resolvable:$true] %s206_s30 }
  0x10   : > { %s3829_s7 = smov [#allocation11]   ;;  %s3589_s11 = scalar_lea.hbm %s4315_s2, 16 }
  0x11   : > { %p3918_p7 = pnand %p3505_p6, %p4319_p1  ;;  %s3924_s8 = sshll.u32 %s3829_s7, 4  ;;  %s221_s8 = int_to_ptr.vmem [resolvable:$true] %s3924_s8 }
  0x12   : > { %p3590_p8 = scmp.ne.s32.totalorder %s4315_s2, %s3589_s11  ;;  %p3596_p12 = scmp.lt.u32.totalorder %s3589_s11, %s4315_s2 }
  0x13   : > { %p3934_p9 = pneg %p3918_p7 }
  0x15   : > { %p3592_p10 = pnand %p3934_p9, %p3590_p8 }
  0x17   : > { %p3593_p11 = pneg %p3592_p10 }
  0x19   : > { %p3598_p13 = pnand %p3596_p12, %p3593_p11 }
  0x1b   : > { %3601 = shalt.err (!%p3598_p13)
}
  0x1c   : > { %s3602_s17 = scalar_lea.vmem %s197_s28, 16  ;;  %s3609_s18 = scalar_lea.vmem %s197_s28, 32 }
  0x1d   : > { %p3603_p0 = scmp.ne.s32.totalorder %s197_s28, %s3602_s17  ;;  %p3610_p6 = scmp.lt.s32.totalorder %s197_s28, %s197_s28 }
  0x1e   : > { %p3611_p1 = scmp.lt.s32.totalorder %s3609_s18, %s3602_s17 }
  0x1f   : > { %p3605_p2 = pnand %p3603_p0, %p3934_p9 }
  0x20   : > { %p3612_p4 = por %p3611_p1, %p3610_p6 }
  0x21   : > { %p3606_p3 = pneg %p3605_p2 }
  0x23   : > { %p3613_p5 = pnand %p3612_p4, %p3606_p3 }
  0x25   : > { %3616 = shalt.err (!%p3613_p5)
}
  0x26   : > { %3508 = dma.hbm_to_vmem [thread:$0]  (!%p3918_p7), %s4315_s2, 16, %s197_s28, [#allocation7]  }
  0x27   : > { %s3617_s10 = scalar_lea.hbm %s4316_s3, 8192 }
  0x28   : > { %p3618_p8 = scmp.ne.s32.totalorder %s4316_s3, %s3617_s10  ;;  %p3624_p4 = scmp.lt.u32.totalorder %s3617_s10, %s4316_s3 }
  0x2a   : > { %p3620_p10 = pnand %p3618_p8, %p3934_p9 }
  0x2c   : > { %p3621_p1 = pneg %p3620_p10 }
  0x2e   : > { %p3626_p5 = pnand %p3624_p4, %p3621_p1 }
  0x30   : > { %3629 = shalt.err (!%p3626_p5)
}
  0x31   : > { %s3630_s28 = scalar_lea.vmem %s3922_s30, 8192  ;;  %p3638_p0 = scmp.lt.s32.totalorder %s3922_s30, %s3922_s30 }
  0x32   : > { %p3631_p11 = scmp.ne.s32.totalorder %s3922_s30, %s3630_s28  ;;  %p3639_p2 = scmp.lt.s32.totalorder %s3630_s28, %s3630_s28 }
  0x34   : > { %p3633_p12 = pnand %p3631_p11, %p3934_p9  ;;  %p3640_p3 = por %p3639_p2, %p3638_p0 }
  0x36   : > { %p3634_p13 = pneg %p3633_p12 }
  0x38   : > { %p3641_p6 = pnand %p3640_p3, %p3634_p13 }
  0x3a   : > { %3644 = shalt.err (!%p3641_p6)
}
  0x3b   : > { %s3830_s16 = smov 512   ;;  %s3831_s17 = smov 32  }
  0x3c   : > { %3511 = dma.hbm_to_vmem [thread:$0]  (!%p3918_p7), %s4316_s3, 8192, %s3922_s30, [#allocation10], %s3830_s16, %s3830_s16, %s3831_s17  }
  0x3d   : > { %s3645_s9 = scalar_lea.hbm %s4317_s4, 128 }
  0x3e   : > { %p3646_p8 = scmp.ne.s32.totalorder %s4317_s4, %s3645_s9  ;;  %p3652_p4 = scmp.lt.u32.totalorder %s3645_s9, %s4317_s4 }
  0x40   : > { %p3648_p10 = pnand %p3646_p8, %p3934_p9 }
  0x42   : > { %p3649_p1 = pneg %p3648_p10 }
  0x44   : > { %p3654_p5 = pnand %p3652_p4, %p3649_p1 }
  0x46   : > { %3657 = shalt.err (!%p3654_p5)
}
  0x47   : > { %s3658_s15 = scalar_lea.vmem %s221_s8, 128  ;;  %p3666_p0 = scmp.lt.s32.totalorder %s221_s8, %s221_s8 }
  0x48   : > { %p3659_p11 = scmp.ne.s32.totalorder %s221_s8, %s3658_s15  ;;  %p3667_p2 = scmp.lt.s32.totalorder %s3658_s15, %s3658_s15 }
  0x4a   : > { %p3661_p12 = pnand %p3659_p11, %p3934_p9  ;;  %p3668_p3 = por %p3667_p2, %p3666_p0 }
  0x4c   : > { %p3662_p13 = pneg %p3661_p12 }
  0x4e   : > { %p3669_p6 = pnand %p3668_p3, %p3662_p13 }
  0x50   : > { %3672 = shalt.err (!%p3669_p6)
}
  0x51   : > { %3514 = dma.hbm_to_vmem [thread:$0]  (!%p3918_p7), %s4317_s4, 128, %s221_s8, [#allocation10]  }
  0x52   : > { %s44_s14 = sadd.s32 1, %s3813_s20  ;;  %s32_s16 = sadd.s32 1, %s3821_s22 }
  0x53   : > { %p51_p9 = scmp.ne.s32.totalorder %s3813_s20, %s3809_s19  ;;  %p33_p8 = scmp.ge.s32.totalorder %s32_s16, 5 }
  0x54   : > { %p52_p10 = scmp.eq.s32.totalorder %s3825_s23, 0  ;;  %p3525_p1 = scmp.lt.s32.totalorder %s3825_s23, 5 }
  0x55   : > { %s3999_s6 = sand.u32 1, %s3813_s20   ;;  %s4339_s16 = smov (%p33_p8, %s32_s16), 0 }
  0x56   : > { %p53_p4 = por %p52_p10, %p51_p9  ;;  %s40_s17 = ssub.s32 %s3821_s22, %s4339_s16 }
  0x57   : > { %s2097_s8 = sshll.u32 %s3999_s6, 7  ;;  %p42_p7 = scmp.eq.s32.totalorder %s40_s17, 0 }
  0x58   : > { %s2116_s18 = sshll.u32 %s3821_s22, 11  ;;  %s235_s27 = scalar_lea.vmem [#allocation3], %s2097_s8 }
  0x59   : > { %s245_s29 = sshll.u32 %s235_s27, 4  ;;  %s4013_s11 = scalar_lea.hbm %s4313_s0, %s2116_s18  ;;  %s4015_s29 = int_to_ptr.vmem [resolvable:$true] %s245_s29 }
  0x5a   : > { %s4008_s7 = scalar_select %p42_p7, %s3813_s20, %s44_s14  }
  0x5b   : > { %p4019_p5 = pnand %p3525_p1, %p53_p4  ;;  %s2100_s13 = sshll.u32 %s3999_s6, 10 }
  0x5c   : > { %s2117_s15 = sshll.u32 %s3821_s22, 14  ;;  %s4025_s30 = scalar_lea.vmem [#allocation6], %s2100_s13 }
  0x5d   : > { %s263_s28 = sshll.u32 %s4025_s30, 4  ;;  %s232_s14 = scalar_lea.sflag [#allocation4], %s3999_s6  ;;  %s4056_s28 = int_to_ptr.vmem [resolvable:$true] %s263_s28 }
  0x5e   : > { %s3673_s17 = scalar_lea.hbm %s4013_s11, 2048  ;;  %p3675_p12 = pneg %p4019_p5 }
  0x5f   : > { %p3674_p11 = scmp.ne.s32.totalorder %s4013_s11, %s3673_s17  ;;  %s3678_s27 = scalar_lea.hbm %s4313_s0, 10240 }
  0x60   : > { %p3679_p2 = scmp.lt.u32.totalorder %s4013_s11, %s4313_s0  ;;  %p3680_p3 = scmp.lt.u32.totalorder %s3678_s27, %s3673_s17 }
  0x61   : > { %p3676_p13 = pnand %p3675_p12, %p3674_p11  ;;  %p3682_p9 = scmp.lt.u32.totalorder %s3673_s17, %s4013_s11 }
  0x62   : > { %p3681_p6 = por %p3680_p3, %p3679_p2 }
  0x63   : > { %p3677_p0 = pneg %p3676_p13 }
  0x64   : > { %p3683_p8 = por %p3682_p9, %p3681_p6 }
  0x66   : > { %p3684_p10 = pnand %p3683_p8, %p3677_p0 }
  0x68   : > { %3687 = shalt.err (!%p3684_p10)
}
  0x69   : > { %s3688_s6 = scalar_lea.vmem %s4015_s29, 2048  ;;  %s3832_s13 = smov [#allocation3]  }
  0x6a   : > { %p3689_p1 = scmp.ne.s32.totalorder %s4015_s29, %s3688_s6  ;;  %s3693_s8 = sshll.u32 %s3832_s13, 4  ;;  %s3694_s8 = int_to_ptr.vmem [resolvable:$false] %s3693_s8 }
  0x6b   : > { %s3695_s18 = scalar_lea.vmem %s3694_s8, 4096  ;;  %p3696_p11 = scmp.lt.s32.totalorder %s4015_s29, %s3694_s8 }
  0x6c   : > { %p3691_p4 = pnand %p3689_p1, %p3675_p12  ;;  %p3697_p13 = scmp.lt.s32.totalorder %s3695_s18, %s3688_s6 }
  0x6e   : > { %p3692_p7 = pneg %p3691_p4  ;;  %p3698_p2 = por %p3697_p13, %p3696_p11 }
  0x70   : > { %p3699_p3 = pnand %p3698_p2, %p3692_p7 }
  0x72   : > { %3702 = shalt.err (!%p3699_p3)
}
  0x73   : > { %3518 = dma.hbm_to_vmem [thread:$0]  (!%p4019_p5), %s4013_s11, 2048, %s4015_s29, %s232_s14  }
  0x74   : > { %s252_s17 = sand.u32 1, %s3825_s23   ;;  %s4064_s10 = scalar_lea.hbm %s4314_s1, %s2117_s15 }
  0x75   : > { %s4066_s6 = scalar_lea.sflag [#allocation7], %s252_s17  ;;  %s3703_s13 = scalar_lea.hbm %s4064_s10, 16384 }
  0x76   : > { %p3704_p0 = scmp.ne.s32.totalorder %s4064_s10, %s3703_s13  ;;  %s3708_s30 = scalar_lea.hbm %s4314_s1, 81920 }
  0x77   : > { %p3709_p8 = scmp.lt.u32.totalorder %s4064_s10, %s4314_s1  ;;  %p3710_p10 = scmp.lt.u32.totalorder %s3708_s30, %s3703_s13 }
  0x78   : > { %p3706_p6 = pnand %p3704_p0, %p3675_p12  ;;  %p3712_p4 = scmp.lt.u32.totalorder %s3703_s13, %s4064_s10 }
  0x79   : > { %p3711_p1 = por %p3710_p10, %p3709_p8 }
  0x7a   : > { %p3707_p9 = pneg %p3706_p6 }
  0x7b   : > { %p3713_p7 = por %p3712_p4, %p3711_p1 }
  0x7d   : > { %p3714_p11 = pnand %p3713_p7, %p3707_p9 }
  0x7f   : > { %3717 = shalt.err (!%p3714_p11)
}
  0x80   : > { %s3718_s15 = scalar_lea.vmem %s4056_s28, 16384  ;;  %s3833_s18 = smov [#allocation6]  }
  0x81   : > { %p3719_p13 = scmp.ne.s32.totalorder %s4056_s28, %s3718_s15  ;;  %s3723_s17 = sshll.u32 %s3833_s18, 4  ;;  %s3724_s17 = int_to_ptr.vmem [resolvable:$false] %s3723_s17 }
  0x82   : > { %s3725_s27 = scalar_lea.vmem %s3724_s17, 32768  ;;  %p3726_p0 = scmp.lt.s32.totalorder %s4056_s28, %s3724_s17 }
  0x83   : > { %p3721_p2 = pnand %p3719_p13, %p3675_p12  ;;  %p3727_p6 = scmp.lt.s32.totalorder %s3725_s27, %s3718_s15 }
  0x85   : > { %p3722_p3 = pneg %p3721_p2  ;;  %p3728_p8 = por %p3727_p6, %p3726_p0 }
  0x87   : > { %p3729_p10 = pnand %p3728_p8, %p3722_p3 }
  0x89   : > { %3732 = shalt.err (!%p3729_p10)
}
  0x8a   : > { %s3834_s9 = smov 64   ;;  %s3835_s13 = smov 4  }
  0x8b   : > { %3521 = dma.hbm_to_vmem [thread:$0]  (!%p4019_p5), %s4064_s10, 16384, %s4056_s28, %s4066_s6, %s3834_s9, %s3834_s9, %s3835_s13  }
  0x8c   : > { %p4327_p12 = scmp.ne.s32.totalorder %s4323_s26, 0 }
  0x8d   : > { %s277_s29 = sand.u32 (!%p4327_p12), 1, %s3809_s19   ;;  %p4328_p9 = scmp.ne.s32.totalorder (!%p4327_p12), %s4322_s25, 0 }
  0x8e   : > { %275 = sbr.rel (%p4327_p12) target bundleno = 803 (0x323), region = 40  ;;  %s2104_s11 = sshll.u32 (!%p4327_p12), %s277_s29, 7 }
  0x8f   : > { %s278_s30 = scalar_lea.sflag (!%p4327_p12), [#allocation4], %s277_s29  ;;  %s4095_s14 = scalar_lea.vmem (!%p4327_p12), [#allocation3], %s2104_s11 }
  0x95   : > { %3784 = dma.done.wait (%p4328_p9), %s278_s30, 2048  }
  0x96   : > { %3786 = vsyncadd (%p4328_p9), %s278_s30, 4294965248  ;;  %s286_s8 = sand.u32 1, %s3898_s24   ;;  %s2105_s12 = sshll.u32 %s277_s29, 10 }
  0x97   : > { %s287_s28 = scalar_lea.sflag [#allocation7], %s286_s8  ;;  %s4102_s10 = scalar_lea.vmem [#allocation6], %s2105_s12 }
  0x98   : > { %3788 = dma.done.wait (%p4328_p9), %s287_s28, 16384  }
  0x99   : > { %3790 = vsyncadd (%p4328_p9), %s287_s28, 4294950912  ;;  %p4329_p5 = scmp.eq.s32.totalorder %s3898_s24, 0 }
  0x9b   : > { %3792 = dma.done.wait (%p4329_p5), [#allocation7], 16   ;;  %p4330_p1 = pmov %p4329_p5 }
  0x9d   : > { %3794 = vsyncadd (%p4330_p1), [#allocation7], 4294967280  ;;  %p4331_p4 = pmov %p4330_p1 }
  0x9e   : > { %p4332_p7 = pmov %p4330_p1 }
  0x9f   : > { %3796 = dma.done.wait (%p4331_p4), [#allocation10], 8320  }
  0xa0   : > { %3798 = vsyncadd (%p4332_p7), [#allocation10], 4294958976  ;;  %p2109_p11 = scmp.ne.s32.totalorder %s3817_s21, 0 }
  0xa1   : > { %v3836_v0 = vmov (!%p2109_p11), 0.0  }
  0xa2   : > { %334 = sbr.rel (%p2109_p11) target bundleno = 169 (0xa9), region = 64  ;;  %335 = vst [vmem:[#allocation2] sm:$0xff] (!%p2109_p11), %v3836_v0 }
  0xa9 PF: > { %v2637_v1 = vld [vmem:[%s4102_s10 + $0x40] sm:$0xff]   ;;  %v2638_v5 = vld [vmem:[%s4102_s10 + $0x48] sm:$0xff]   ;;  %v2639_v9 = vld [vmem:[%s4102_s10 + $0x50] sm:$0xff]   ;;  %p2110_p13 = scmp.ne.s32.totalorder %s3817_s21, 4 }
  0xaa   : > { %v2653_v2 = vld [vmem:[%s4102_s10 + $0xc0] sm:$0xff]   ;;  %3038 = vmatprep.subr.bf16.mxu0 %v2637_v1  ;;  %v2654_v6 = vld [vmem:[%s4102_s10 + $0xc8] sm:$0xff]   ;;  %v2655_v10 = vld [vmem:[%s4102_s10 + $0xd0] sm:$0xff]  }
  0xab   : > { %v2119_v3 = vld [vmem:[%s4102_s10] sm:$0xff]   ;;  %3070 = vmatprep.subr.bf16.mxu1 %v2653_v2  ;;  %v2630_v7 = vld [vmem:[%s4102_s10 + $0x8] sm:$0xff]   ;;  %v2631_v11 = vld [vmem:[%s4102_s10 + $0x10] sm:$0xff]  }
  0xac   : > { %v2645_v4 = vld [vmem:[%s4102_s10 + $0x80] sm:$0xff]   ;;  %3040 = vmatpush3.bf16.msra.mxu0 %v2119_v3  ;;  %v2646_v8 = vld [vmem:[%s4102_s10 + $0x88] sm:$0xff]   ;;  %v2647_v12 = vld [vmem:[%s4102_s10 + $0x90] sm:$0xff]  }
  0xad   : > { %3072 = vmatpush3.bf16.msra.mxu1 %v2645_v4  ;;  %3042 = vmatprep.subr.bf16.mxu0 %v2638_v5  ;;  %v2640_v13 = vld [vmem:[%s4102_s10 + $0x58] sm:$0xff]   ;;  %v338_v15 = vld [vmem:[%s4095_s14 + $0x8] sm:$0xff]  ;;  %v2641_v19 = vld [vmem:[%s4102_s10 + $0x60] sm:$0xff]  }
  0xae   : > { %3074 = vmatprep.subr.bf16.mxu1 %v2654_v6  ;;  %v2656_v14 = vld [vmem:[%s4102_s10 + $0xd8] sm:$0xff]   ;;  %v2657_v20 = vld [vmem:[%s4102_s10 + $0xe0] sm:$0xff]   ;;  %929 = vmatprep.mubr.f32.mxu0 %v338_v15  ;;  %v2642_v23 = vld [vmem:[%s4102_s10 + $0x68] sm:$0xff]  }
  0xaf   : > { %v2632_v16 = vld [vmem:[%s4102_s10 + $0x18] sm:$0xff]   ;;  %v2633_v21 = vld [vmem:[%s4102_s10 + $0x20] sm:$0xff]   ;;  %v2658_v24 = vld [vmem:[%s4102_s10 + $0xe8] sm:$0xff]  }
  0xb0   : > { %3044 = vmatpush3.bf16.msra.mxu0 %v2630_v7  ;;  %v2648_v17 = vld [vmem:[%s4102_s10 + $0x98] sm:$0xff]   ;;  %v2649_v22 = vld [vmem:[%s4102_s10 + $0xa0] sm:$0xff]   ;;  %v2634_v25 = vld [vmem:[%s4102_s10 + $0x28] sm:$0xff]  }
  0xb1   : > { %3076 = vmatpush3.bf16.msra.mxu1 %v2646_v8  ;;  %3046 = vmatprep.subr.bf16.mxu0 %v2639_v9  ;;  %v340_v18 = vld [vmem:[%s4095_s14 + $0x18] sm:$0xff]  ;;  %v2650_v26 = vld [vmem:[%s4102_s10 + $0xa8] sm:$0xff]   ;;  %v2643_v27 = vld [vmem:[%s4102_s10 + $0x70] sm:$0xff]  }
  0xb2   : > { %3078 = vmatprep.subr.bf16.mxu1 %v2655_v10  ;;  %999 = vmatprep.mubr.f32.mxu1 %v340_v18  ;;  %v2659_v28 = vld [vmem:[%s4102_s10 + $0xf0] sm:$0xff]   ;;  %v2644_v31 = vld [vmem:[%s4102_s10 + $0x78] sm:$0xff]   ;;  %v2669_v35 = vld [vmem:[%s4102_s10 + $0x140] sm:$0xff]  }
  0xb3   : > { %v2635_v29 = vld [vmem:[%s4102_s10 + $0x30] sm:$0xff]   ;;  %v2660_v32 = vld [vmem:[%s4102_s10 + $0xf8] sm:$0xff]   ;;  %v2685_v36 = vld [vmem:[%s4102_s10 + $0x1c0] sm:$0xff]  }
  0xb4   : > { %3048 = vmatpush3.bf16.msra.mxu0 %v2631_v11  ;;  %v2651_v30 = vld [vmem:[%s4102_s10 + $0xb0] sm:$0xff]   ;;  %v2636_v33 = vld [vmem:[%s4102_s10 + $0x38] sm:$0xff]   ;;  %v337_v37 = vld [vmem:[%s4095_s14] sm:$0xff] }
  0xb5   : > { %3080 = vmatpush3.bf16.msra.mxu1 %v2647_v12  ;;  %3050 = vmatprep.subr.bf16.mxu0 %v2640_v13  ;;  %v2652_v34 = vld [vmem:[%s4102_s10 + $0xb8] sm:$0xff]   ;;  %v339_v38 = vld [vmem:[%s4095_s14 + $0x10] sm:$0xff]  ;;  %v2661_v39 = vld [vmem:[%s4102_s10 + $0x100] sm:$0xff]  }
  0xb6   : > { %3082 = vmatprep.subr.bf16.mxu1 %v2656_v14  ;;  %v2677_v40 = vld [vmem:[%s4102_s10 + $0x180] sm:$0xff]   ;;  %v2670_v41 = vld [vmem:[%s4102_s10 + $0x148] sm:$0xff]   ;;  %v344_v44 = vld [vmem:[%s4095_s14 + $0x38] sm:$0xff] }
  0xb7   : > { %v2686_v42 = vld [vmem:[%s4102_s10 + $0x1c8] sm:$0xff]   ;;  %v2671_v47 = vld [vmem:[%s4102_s10 + $0x150] sm:$0xff]   ;;  %v2672_v51 = vld [vmem:[%s4102_s10 + $0x158] sm:$0xff]  }
  0xb8   : > { %3052 = vmatpush3.bf16.msra.mxu0 %v2632_v16  ;;  %v342_v43 = vld [vmem:[%s4095_s14 + $0x28] sm:$0xff]  ;;  %v2687_v48 = vld [vmem:[%s4102_s10 + $0x1d0] sm:$0xff]   ;;  %v2688_v52 = vld [vmem:[%s4102_s10 + $0x1d8] sm:$0xff]  }
  0xb9   : > { %3084 = vmatpush3.bf16.msra.mxu1 %v2648_v17  ;;  %3054 = vmatprep.subr.bf16.mxu0 %v2641_v19  ;;  %v2662_v45 = vld [vmem:[%s4102_s10 + $0x108] sm:$0xff]   ;;  %v2663_v49 = vld [vmem:[%s4102_s10 + $0x110] sm:$0xff]   ;;  %v2664_v53 = vld [vmem:[%s4102_s10 + $0x118] sm:$0xff]  }
  0xba   : > { %3086 = vmatprep.subr.bf16.mxu1 %v2657_v20  ;;  %v2678_v46 = vld [vmem:[%s4102_s10 + $0x188] sm:$0xff]   ;;  %v2679_v50 = vld [vmem:[%s4102_s10 + $0x190] sm:$0xff]   ;;  %v2680_v54 = vld [vmem:[%s4102_s10 + $0x198] sm:$0xff]  }
  0xbb   : > { %v2673_v55 = vld [vmem:[%s4102_s10 + $0x160] sm:$0xff]   ;;  %v2674_v59 = vld [vmem:[%s4102_s10 + $0x168] sm:$0xff]   ;;  %v2675_v63 = vld [vmem:[%s4102_s10 + $0x170] sm:$0xff]  }
  0xbc   : > { %3056 = vmatpush3.bf16.msra.mxu0 %v2633_v21  ;;  %v2689_v56 = vld [vmem:[%s4102_s10 + $0x1e0] sm:$0xff]   ;;  %v2690_v60 = vld [vmem:[%s4102_s10 + $0x1e8] sm:$0xff]   ;;  %v2691_v0 = vld [vmem:[%s4102_s10 + $0x1f0] sm:$0xff]  }
  0xbd   : > { %3088 = vmatpush3.bf16.msra.mxu1 %v2649_v22  ;;  %3058 = vmatprep.subr.bf16.mxu0 %v2642_v23  ;;  %v2665_v57 = vld [vmem:[%s4102_s10 + $0x120] sm:$0xff]   ;;  %v2666_v61 = vld [vmem:[%s4102_s10 + $0x128] sm:$0xff]   ;;  %v2667_v1 = vld [vmem:[%s4102_s10 + $0x130] sm:$0xff]  }
  0xbe   : > { %3090 = vmatprep.subr.bf16.mxu1 %v2658_v24  ;;  %v2681_v58 = vld [vmem:[%s4102_s10 + $0x1a0] sm:$0xff]   ;;  %v2682_v62 = vld [vmem:[%s4102_s10 + $0x1a8] sm:$0xff]   ;;  %v2683_v2 = vld [vmem:[%s4102_s10 + $0x1b0] sm:$0xff]  }
  0xbf   : > { %v2676_v3 = vld [vmem:[%s4102_s10 + $0x178] sm:$0xff]   ;;  %v2701_v7 = vld [vmem:[%s4102_s10 + $0x240] sm:$0xff]   ;;  %v343_v10 = vld [vmem:[%s4095_s14 + $0x30] sm:$0xff] }
  0xc0   : > { %3060 = vmatpush3.bf16.msra.mxu0 %v2634_v25  ;;  %v2692_v4 = vld [vmem:[%s4102_s10 + $0x1f8] sm:$0xff]   ;;  %v2717_v8 = vld [vmem:[%s4102_s10 + $0x2c0] sm:$0xff]   ;;  %v2702_v13 = vld [vmem:[%s4102_s10 + $0x248] sm:$0xff]  }
  0xc1   : > { %3092 = vmatpush3.bf16.msra.mxu1 %v2650_v26  ;;  %3062 = vmatprep.subr.bf16.mxu0 %v2643_v27  ;;  %v2668_v5 = vld [vmem:[%s4102_s10 + $0x138] sm:$0xff]   ;;  %v341_v9 = vld [vmem:[%s4095_s14 + $0x20] sm:$0xff]  ;;  %v2718_v14 = vld [vmem:[%s4102_s10 + $0x2c8] sm:$0xff]  }
  0xc2   : > { %3094 = vmatprep.subr.bf16.mxu1 %v2659_v28  ;;  %v2684_v6 = vld [vmem:[%s4102_s10 + $0x1b8] sm:$0xff]   ;;  %v2693_v11 = vld [vmem:[%s4102_s10 + $0x200] sm:$0xff]   ;;  %v346_v15 = vld [vmem:[%s4095_s14 + $0x48] sm:$0xff] }
  0xc3   : > { %v2709_v12 = vld [vmem:[%s4102_s10 + $0x280] sm:$0xff]   ;;  %v348_v16 = vld [vmem:[%s4095_s14 + $0x58] sm:$0xff]  ;;  %v2694_v17 = vld [vmem:[%s4102_s10 + $0x208] sm:$0xff]  }
  0xc4   : > { %3064 = vmatpush3.bf16.msra.mxu0 %v2635_v29  ;;  %v2710_v18 = vld [vmem:[%s4102_s10 + $0x288] sm:$0xff]   ;;  %v2703_v19 = vld [vmem:[%s4102_s10 + $0x250] sm:$0xff]   ;;  %v2704_v23 = vld [vmem:[%s4102_s10 + $0x258] sm:$0xff]  }
  0xc5   : > { %3096 = vmatpush3.bf16.msra.mxu1 %v2651_v30  ;;  %3066 = vmatprep.subr.bf16.mxu0 %v2644_v31  ;;  %v2719_v20 = vld [vmem:[%s4102_s10 + $0x2d0] sm:$0xff]   ;;  %v2720_v24 = vld [vmem:[%s4102_s10 + $0x2d8] sm:$0xff]   ;;  %v2705_v27 = vld [vmem:[%s4102_s10 + $0x260] sm:$0xff]  }
  0xc6   : > { %3098 = vmatprep.subr.bf16.mxu1 %v2660_v32  ;;  %v2695_v21 = vld [vmem:[%s4102_s10 + $0x210] sm:$0xff]   ;;  %v2696_v25 = vld [vmem:[%s4102_s10 + $0x218] sm:$0xff]   ;;  %v2721_v28 = vld [vmem:[%s4102_s10 + $0x2e0] sm:$0xff]  }
  0xc7   : > { %v2711_v22 = vld [vmem:[%s4102_s10 + $0x290] sm:$0xff]   ;;  %v2712_v26 = vld [vmem:[%s4102_s10 + $0x298] sm:$0xff]   ;;  %v2697_v29 = vld [vmem:[%s4102_s10 + $0x220] sm:$0xff]  }
  0xc8   : > { %3068 = vmatpush3.bf16.msra.mxu0 %v2636_v33  ;;  %v2713_v30 = vld [vmem:[%s4102_s10 + $0x2a0] sm:$0xff]   ;;  %v2706_v31 = vld [vmem:[%s4102_s10 + $0x268] sm:$0xff]  }
  0xc9   : > { %3100 = vmatpush3.bf16.msra.mxu1 %v2652_v34  ;;  %3102 = vmatprep.subr.bf16.mxu0 %v2669_v35  ;;  %v2722_v32 = vld [vmem:[%s4102_s10 + $0x2e8] sm:$0xff]   ;;  %v2707_v35 = vld [vmem:[%s4102_s10 + $0x270] sm:$0xff]  }
  0xca   : > { %3134 = vmatprep.subr.bf16.mxu1 %v2685_v36  ;;  %v2698_v33 = vld [vmem:[%s4102_s10 + $0x228] sm:$0xff]   ;;  %v2723_v36 = vld [vmem:[%s4102_s10 + $0x2f0] sm:$0xff]  }
  0xcb   : > { %930 = vmatmul.mubr.f32.vlgmr.msra.gmra.mrb[0].mxu0 %v337_v37  ;;  %v2714_v34 = vld [vmem:[%s4102_s10 + $0x2a8] sm:$0xff]   ;;  %v2699_v37 = vld [vmem:[%s4102_s10 + $0x230] sm:$0xff]  }
  0xcc   : > { %1000 = vmatmul.mubr.f32.vlgmr.msra.gmra.mrb[0].mxu1 %v339_v38  ;;  %3104 = vmatpush3.bf16.msra.mxu0 %v2661_v39  ;;  %v2715_v38 = vld [vmem:[%s4102_s10 + $0x2b0] sm:$0xff]   ;;  %v2708_v39 = vld [vmem:[%s4102_s10 + $0x278] sm:$0xff]  }
  0xcd   : > { %3136 = vmatpush3.bf16.msra.mxu1 %v2677_v40  ;;  %3106 = vmatprep.subr.bf16.mxu0 %v2670_v41  ;;  %v2724_v40 = vld [vmem:[%s4102_s10 + $0x2f8] sm:$0xff]  }
  0xce   : > { %3138 = vmatprep.subr.bf16.mxu1 %v2686_v42  ;;  %1069 = vmatprep.mubr.f32.mxu0 %v342_v43  ;;  %v2700_v41 = vld [vmem:[%s4102_s10 + $0x238] sm:$0xff]   ;;  %v2733_v43 = vld [vmem:[%s4102_s10 + $0x340] sm:$0xff]  }
  0xcf   : > { %1139 = vmatprep.mubr.f32.mxu1 %v344_v44  ;;  %v2716_v42 = vld [vmem:[%s4102_s10 + $0x2b8] sm:$0xff]   ;;  %v2749_v44 = vld [vmem:[%s4102_s10 + $0x3c0] sm:$0xff]  }
  0xd0   : > { %3108 = vmatpush3.bf16.msra.mxu0 %v2662_v45  ;;  %v345_v45 = vld [vmem:[%s4095_s14 + $0x40] sm:$0xff] }
  0xd1   : > { %3140 = vmatpush3.bf16.msra.mxu1 %v2678_v46  ;;  %3110 = vmatprep.subr.bf16.mxu0 %v2671_v47  ;;  %v347_v46 = vld [vmem:[%s4095_s14 + $0x50] sm:$0xff]  ;;  %v2725_v47 = vld [vmem:[%s4102_s10 + $0x300] sm:$0xff]  }
  0xd2   : > { %3142 = vmatprep.subr.bf16.mxu1 %v2687_v48  ;;  %v2741_v48 = vld [vmem:[%s4102_s10 + $0x380] sm:$0xff]  }
  0xd4   : > { %3112 = vmatpush3.bf16.msra.mxu0 %v2663_v49  ;;  %v2734_v49 = vld [vmem:[%s4102_s10 + $0x348] sm:$0xff]  }
  0xd5   : > { %3144 = vmatpush3.bf16.msra.mxu1 %v2679_v50  ;;  %3114 = vmatprep.subr.bf16.mxu0 %v2672_v51  ;;  %v2750_v50 = vld [vmem:[%s4102_s10 + $0x3c8] sm:$0xff]  }
  0xd6   : > { %3146 = vmatprep.subr.bf16.mxu1 %v2688_v52  ;;  %v350_v51 = vld [vmem:[%s4095_s14 + $0x68] sm:$0xff]  ;;  %v352_v52 = vld [vmem:[%s4095_s14 + $0x78] sm:$0xff] }
  0xd8   : > { %3116 = vmatpush3.bf16.msra.mxu0 %v2664_v53  ;;  %v2726_v53 = vld [vmem:[%s4102_s10 + $0x308] sm:$0xff]  }
  0xd9   : > { %3148 = vmatpush3.bf16.msra.mxu1 %v2680_v54  ;;  %3118 = vmatprep.subr.bf16.mxu0 %v2673_v55  ;;  %v2742_v54 = vld [vmem:[%s4102_s10 + $0x388] sm:$0xff]   ;;  %v2735_v55 = vld [vmem:[%s4102_s10 + $0x350] sm:$0xff]  }
  0xda   : > { %3150 = vmatprep.subr.bf16.mxu1 %v2689_v56  ;;  %v2751_v56 = vld [vmem:[%s4102_s10 + $0x3d0] sm:$0xff]  }
  0xdc   : > { %3120 = vmatpush3.bf16.msra.mxu0 %v2665_v57  ;;  %v2727_v57 = vld [vmem:[%s4102_s10 + $0x310] sm:$0xff]  }
  0xdd   : > { %3152 = vmatpush3.bf16.msra.mxu1 %v2681_v58  ;;  %3122 = vmatprep.subr.bf16.mxu0 %v2674_v59  ;;  %v2743_v58 = vld [vmem:[%s4102_s10 + $0x390] sm:$0xff]   ;;  %v2736_v59 = vld [vmem:[%s4102_s10 + $0x358] sm:$0xff]  }
  0xde   : > { %3154 = vmatprep.subr.bf16.mxu1 %v2690_v60  ;;  %v2752_v60 = vld [vmem:[%s4102_s10 + $0x3d8] sm:$0xff]  }
  0xe0   : > { %3124 = vmatpush3.bf16.msra.mxu0 %v2666_v61  ;;  %v2728_v61 = vld [vmem:[%s4102_s10 + $0x318] sm:$0xff]  }
  0xe1   : > { %3156 = vmatpush3.bf16.msra.mxu1 %v2682_v62  ;;  %3126 = vmatprep.subr.bf16.mxu0 %v2675_v63  ;;  %v2744_v62 = vld [vmem:[%s4102_s10 + $0x398] sm:$0xff]   ;;  %v2737_v63 = vld [vmem:[%s4102_s10 + $0x360] sm:$0xff]  }
  0xe2   : > { %3158 = vmatprep.subr.bf16.mxu1 %v2691_v0  ;;  %v2753_v0 = vld [vmem:[%s4102_s10 + $0x3e0] sm:$0xff]  }
  0xe4   : > { %3128 = vmatpush3.bf16.msra.mxu0 %v2667_v1  ;;  %v2729_v1 = vld [vmem:[%s4102_s10 + $0x320] sm:$0xff]  }
  0xe5   : > { %3160 = vmatpush3.bf16.msra.mxu1 %v2683_v2  ;;  %3130 = vmatprep.subr.bf16.mxu0 %v2676_v3  ;;  %v2745_v2 = vld [vmem:[%s4102_s10 + $0x3a0] sm:$0xff]   ;;  %v2738_v3 = vld [vmem:[%s4102_s10 + $0x368] sm:$0xff]  }
  0xe6   : > { %3162 = vmatprep.subr.bf16.mxu1 %v2692_v4  ;;  %v2754_v4 = vld [vmem:[%s4102_s10 + $0x3e8] sm:$0xff]  }
  0xe8   : > { %3132 = vmatpush3.bf16.msra.mxu0 %v2668_v5  ;;  %v2730_v5 = vld [vmem:[%s4102_s10 + $0x328] sm:$0xff]  }
  0xe9   : > { %3164 = vmatpush3.bf16.msra.mxu1 %v2684_v6  ;;  %3166 = vmatprep.subr.bf16.mxu0 %v2701_v7  ;;  %v2746_v6 = vld [vmem:[%s4102_s10 + $0x3a8] sm:$0xff]   ;;  %v2739_v7 = vld [vmem:[%s4102_s10 + $0x370] sm:$0xff]  }
  0xea   : > { %3198 = vmatprep.subr.bf16.mxu1 %v2717_v8  ;;  %v2755_v8 = vld [vmem:[%s4102_s10 + $0x3f0] sm:$0xff]  }
  0xeb   : > { %1070 = vmatmul.mubr.f32.vlgmr.msra.gmra.mrb[2].mxu0 %v341_v9  ;;  %v2731_v9 = vld [vmem:[%s4102_s10 + $0x330] sm:$0xff]  }
  0xec   : > { %1140 = vmatmul.mubr.f32.vlgmr.msra.gmra.mrb[2].mxu1 %v343_v10  ;;  %3168 = vmatpush3.bf16.msra.mxu0 %v2693_v11  ;;  %v2747_v10 = vld [vmem:[%s4102_s10 + $0x3b0] sm:$0xff]   ;;  %v2740_v11 = vld [vmem:[%s4102_s10 + $0x378] sm:$0xff]  }
  0xed   : > { %3200 = vmatpush3.bf16.msra.mxu1 %v2709_v12  ;;  %3170 = vmatprep.subr.bf16.mxu0 %v2702_v13  ;;  %v2756_v12 = vld [vmem:[%s4102_s10 + $0x3f8] sm:$0xff]  }
  0xee   : > { %3202 = vmatprep.subr.bf16.mxu1 %v2718_v14  ;;  %1209 = vmatprep.mubr.f32.mxu0 %v346_v15  ;;  %v2732_v13 = vld [vmem:[%s4102_s10 + $0x338] sm:$0xff]   ;;  %v349_v15 = vld [vmem:[%s4095_s14 + $0x60] sm:$0xff] }
  0xef   : > { %1279 = vmatprep.mubr.f32.mxu1 %v348_v16  ;;  %v2748_v14 = vld [vmem:[%s4102_s10 + $0x3b8] sm:$0xff]   ;;  %v351_v16 = vld [vmem:[%s4095_s14 + $0x70] sm:$0xff] }
  0xf0   : > { %3172 = vmatpush3.bf16.msra.mxu0 %v2694_v17 }
  0xf1   : > { %3204 = vmatpush3.bf16.msra.mxu1 %v2710_v18  ;;  %3174 = vmatprep.subr.bf16.mxu0 %v2703_v19 }
  0xf2   : > { %3206 = vmatprep.subr.bf16.mxu1 %v2719_v20 }
  0xf4   : > { %3176 = vmatpush3.bf16.msra.mxu0 %v2695_v21 }
  0xf5   : > { %3208 = vmatpush3.bf16.msra.mxu1 %v2711_v22  ;;  %3178 = vmatprep.subr.bf16.mxu0 %v2704_v23 }
  0xf6   : > { %3210 = vmatprep.subr.bf16.mxu1 %v2720_v24 }
  0xf8   : > { %3180 = vmatpush3.bf16.msra.mxu0 %v2696_v25 }
  0xf9   : > { %3212 = vmatpush3.bf16.msra.mxu1 %v2712_v26  ;;  %3182 = vmatprep.subr.bf16.mxu0 %v2705_v27 }
  0xfa   : > { %3214 = vmatprep.subr.bf16.mxu1 %v2721_v28 }
  0xfc   : > { %3184 = vmatpush3.bf16.msra.mxu0 %v2697_v29 }
  0xfd   : > { %3216 = vmatpush3.bf16.msra.mxu1 %v2713_v30  ;;  %3186 = vmatprep.subr.bf16.mxu0 %v2706_v31 }
  0xfe   : > { %3218 = vmatprep.subr.bf16.mxu1 %v2722_v32 }
 0x100   : > { %3188 = vmatpush3.bf16.msra.mxu0 %v2698_v33 }
 0x101   : > { %3220 = vmatpush3.bf16.msra.mxu1 %v2714_v34  ;;  %3190 = vmatprep.subr.bf16.mxu0 %v2707_v35 }
 0x102   : > { %3222 = vmatprep.subr.bf16.mxu1 %v2723_v36 }
 0x104   : > { %3192 = vmatpush3.bf16.msra.mxu0 %v2699_v37 }
 0x105   : > { %3224 = vmatpush3.bf16.msra.mxu1 %v2715_v38  ;;  %3194 = vmatprep.subr.bf16.mxu0 %v2708_v39 }
 0x106   : > { %3226 = vmatprep.subr.bf16.mxu1 %v2724_v40 }
 0x108   : > { %3196 = vmatpush3.bf16.msra.mxu0 %v2700_v41 }
 0x109   : > { %3228 = vmatpush3.bf16.msra.mxu1 %v2716_v42  ;;  %3230 = vmatprep.subr.bf16.mxu0 %v2733_v43 }
 0x10a   : > { %3262 = vmatprep.subr.bf16.mxu1 %v2749_v44 }
 0x10b   : > { %1210 = vmatmul.mubr.f32.vlgmr.msra.gmra.mrb[4].mxu0 %v345_v45 }
 0x10c   : > { %1280 = vmatmul.mubr.f32.vlgmr.msra.gmra.mrb[4].mxu1 %v347_v46  ;;  %3232 = vmatpush3.bf16.msra.mxu0 %v2725_v47  ;;  %v336_v47 = vld [vmem:[#allocation2] sm:$0xff] }
 0x10d   : > { %3264 = vmatpush3.bf16.msra.mxu1 %v2741_v48  ;;  %3234 = vmatprep.subr.bf16.mxu0 %v2734_v49 }
 0x10e   : > { %3266 = vmatprep.subr.bf16.mxu1 %v2750_v50  ;;  %1349 = vmatprep.mubr.f32.mxu0 %v350_v51  ;;  %v1440_v50 = vld [vmem:[#allocation9] sm:$0xff] (!%p2110_p13) }
 0x10f   : > { %1419 = vmatprep.mubr.f32.mxu1 %v352_v52  ;;  %v1444_v51 = vld [vmem:[#allocation9 + $0x20] sm:$0xff] (!%p2110_p13)  ;;  %v1441_v52 = vld [vmem:[#allocation9 + $0x8] sm:$0xff] (!%p2110_p13) }
 0x110   : > { %3236 = vmatpush3.bf16.msra.mxu0 %v2726_v53  ;;  %v3421_v53 = vcombine.high (!%p2110_p13), %v1440_v50, %v1444_v51 }
 0x111   : > { %3268 = vmatpush3.bf16.msra.mxu1 %v2742_v54  ;;  %3238 = vmatprep.subr.bf16.mxu0 %v2735_v55  ;;  %v1445_v54 = vld [vmem:[#allocation9 + $0x28] sm:$0xff] (!%p2110_p13)  ;;  %v3422_v55 = vcombine.low (!%p2110_p13), %v1440_v50, %v1444_v51  ;;  %v1446_v50 = vld [vmem:[#allocation9 + $0x30] sm:$0xff] (!%p2110_p13)  ;;  %v1443_v51 = vld [vmem:[#allocation9 + $0x18] sm:$0xff] (!%p2110_p13) }
 0x112   : > { %3270 = vmatprep.subr.bf16.mxu1 %v2751_v56  ;;  %v1448_v56 = vld [vmem:[#allocation9 + $0x40] sm:$0xff] (!%p2110_p13) }
 0x114   : > { %3240 = vmatpush3.bf16.msra.mxu0 %v2727_v57  ;;  %v1452_v57 = vld [vmem:[#allocation9 + $0x60] sm:$0xff] (!%p2110_p13) }
 0x115   : > { %3272 = vmatpush3.bf16.msra.mxu1 %v2743_v58  ;;  %3242 = vmatprep.subr.bf16.mxu0 %v2736_v59  ;;  %v3837_v58 = vmov (!%p2110_p13), 0.0   ;;  %v3437_v59 = vcombine.high (!%p2110_p13), %v1441_v52, %v1445_v54 }
 0x116   : > { %3274 = vmatprep.subr.bf16.mxu1 %v2752_v60  ;;  %v3438_v60 = vcombine.low (!%p2110_p13), %v1441_v52, %v1445_v54  ;;  %v1447_v52 = vld [vmem:[#allocation9 + $0x38] sm:$0xff] (!%p2110_p13) }
 0x118   : > { %3244 = vmatpush3.bf16.msra.mxu0 %v2728_v61  ;;  %v3423_v61 = vcombine.high (!%p2110_p13), %v1448_v56, %v1452_v57 }
 0x119   : > { %3276 = vmatpush3.bf16.msra.mxu1 %v2744_v62  ;;  %3246 = vmatprep.subr.bf16.mxu0 %v2737_v63  ;;  %v1449_v62 = vld [vmem:[#allocation9 + $0x48] sm:$0xff] (!%p2110_p13) }
 0x11a   : > { %3278 = vmatprep.subr.bf16.mxu1 %v2753_v0  ;;  %v1453_v63 = vld [vmem:[#allocation9 + $0x68] sm:$0xff] (!%p2110_p13)  ;;  %v1456_v0 = vld [vmem:[#allocation9 + $0x80] sm:$0xff] (!%p2110_p13) }
 0x11c   : > { %3248 = vmatpush3.bf16.msra.mxu0 %v2729_v1  ;;  %v3439_v1 = vcombine.high (!%p2110_p13), %v1449_v62, %v1453_v63 }
 0x11d   : > { %3280 = vmatpush3.bf16.msra.mxu1 %v2745_v2  ;;  %3250 = vmatprep.subr.bf16.mxu0 %v2738_v3  ;;  %v1460_v2 = vld [vmem:[#allocation9 + $0xa0] sm:$0xff] (!%p2110_p13)  ;;  %v1457_v3 = vld [vmem:[#allocation9 + $0x88] sm:$0xff] (!%p2110_p13) }
 0x11e   : > { %3282 = vmatprep.subr.bf16.mxu1 %v2754_v4  ;;  %v1461_v4 = vld [vmem:[#allocation9 + $0xa8] sm:$0xff] (!%p2110_p13) }
 0x120   : > { %3252 = vmatpush3.bf16.msra.mxu0 %v2730_v5  ;;  %v3424_v5 = vcombine.low (!%p2110_p13), %v1448_v56, %v1452_v57 }
 0x121   : > { %3284 = vmatpush3.bf16.msra.mxu1 %v2746_v6  ;;  %3254 = vmatprep.subr.bf16.mxu0 %v2739_v7  ;;  %v3440_v6 = vcombine.low (!%p2110_p13), %v1449_v62, %v1453_v63  ;;  %v3425_v7 = vcombine.high (!%p2110_p13), %v1456_v0, %v1460_v2  ;;  %v1451_v63 = vld [vmem:[#allocation9 + $0x58] sm:$0xff] (!%p2110_p13) }
 0x122   : > { %3286 = vmatprep.subr.bf16.mxu1 %v2755_v8  ;;  %v3441_v8 = vcombine.high (!%p2110_p13), %v1457_v3, %v1461_v4 }
 0x124   : > { %3256 = vmatpush3.bf16.msra.mxu0 %v2731_v9  ;;  %v1464_v9 = vld [vmem:[#allocation9 + $0xc0] sm:$0xff] (!%p2110_p13) }
 0x125   : > { %3288 = vmatpush3.bf16.msra.mxu1 %v2747_v10  ;;  %3258 = vmatprep.subr.bf16.mxu0 %v2740_v11  ;;  %v1468_v10 = vld [vmem:[#allocation9 + $0xe0] sm:$0xff] (!%p2110_p13)  ;;  %v1465_v11 = vld [vmem:[#allocation9 + $0xc8] sm:$0xff] (!%p2110_p13) }
 0x126   : > { %3290 = vmatprep.subr.bf16.mxu1 %v2756_v12  ;;  %v1469_v12 = vld [vmem:[#allocation9 + $0xe8] sm:$0xff] (!%p2110_p13) }
 0x128   : > { %3260 = vmatpush3.bf16.msra.mxu0 %v2732_v13  ;;  %v3426_v13 = vcombine.low (!%p2110_p13), %v1456_v0, %v1460_v2  ;;  %v1455_v0 = vld [vmem:[#allocation9 + $0x78] sm:$0xff] (!%p2110_p13)  ;;  %v3470_v2 = vcombine.low (!%p2110_p13), %v1443_v51, %v1447_v52 }
 0x129   : > { %3292 = vmatpush3.bf16.msra.mxu1 %v2748_v14  ;;  %3294 = vmatprep.subr.bf16.mxu0 (!%p2110_p13), %v3421_v53  ;;  %v3442_v14 = vcombine.low (!%p2110_p13), %v1457_v3, %v1461_v4  ;;  %v3471_v4 = vcombine.high (!%p2110_p13), %v1451_v63, %v1455_v0 }
 0x12a   : > { %3326 = vmatprep.subr.bf16.mxu1 (!%p2110_p13), %v3437_v59  ;;  %v3469_v59 = vcombine.high (!%p2110_p13), %v1443_v51, %v1447_v52 }
 0x12b   : > { %1350 = vmatmul.mubr.f32.vlgmr.msra.gmra.mrb[6].mxu0 %v349_v15  ;;  %v3427_v15 = vcombine.high (!%p2110_p13), %v1464_v9, %v1468_v10 }
 0x12c   : > { %1420 = vmatmul.mubr.f32.vlgmr.msra.gmra.mrb[6].mxu1 %v351_v16  ;;  %1738 = vmatprep.mubr.f32.mxu0 (!%p2110_p13), %v3837_v58  ;;  %v3443_v16 = vcombine.high (!%p2110_p13), %v1465_v11, %v1469_v12 }
 0x12d   : > { %1809 = vmatprep.mubr.f32.mxu1 (!%p2110_p13), %v3837_v58  ;;  %3296 = vmatpush1.bf16.msra.mxu0 (!%p2110_p13), %v3422_v55  ;;  %v2111_v55 = vld [vmem:[#allocation8] ss:$0 sm:$0xff] (!%p2110_p13) }
 0x12e   : > { %3328 = vmatpush1.bf16.msra.mxu1 (!%p2110_p13), %v3438_v60  ;;  %3298 = vmatprep.subr.bf16.mxu0 (!%p2110_p13), %v3423_v61  ;;  %v1450_v60 = vld [vmem:[#allocation9 + $0x50] sm:$0xff] (!%p2110_p13) }
 0x12f   : > { %3330 = vmatprep.subr.bf16.mxu1 (!%p2110_p13), %v3439_v1  ;;  %v1454_v61 = vld [vmem:[#allocation9 + $0x70] sm:$0xff] (!%p2110_p13) }
 0x130   : > { %v3455_v3 = vcombine.high (!%p2110_p13), %v1450_v60, %v1454_v61 }
 0x131   : > { %3300 = vmatpush1.bf16.msra.mxu0 (!%p2110_p13), %v3424_v5  ;;  %v1458_v5 = vld [vmem:[#allocation9 + $0x90] sm:$0xff] (!%p2110_p13) }
 0x132   : > { %3332 = vmatpush1.bf16.msra.mxu1 (!%p2110_p13), %v3440_v6  ;;  %3302 = vmatprep.subr.bf16.mxu0 (!%p2110_p13), %v3425_v7  ;;  %v1462_v6 = vld [vmem:[#allocation9 + $0xb0] sm:$0xff] (!%p2110_p13)  ;;  %v1459_v7 = vld [vmem:[#allocation9 + $0x98] sm:$0xff] (!%p2110_p13) }
 0x133   : > { %3334 = vmatprep.subr.bf16.mxu1 (!%p2110_p13), %v3441_v8  ;;  %v1463_v8 = vld [vmem:[#allocation9 + $0xb8] sm:$0xff] (!%p2110_p13) }
 0x135   : > { %3304 = vmatpush1.bf16.msra.mxu0 (!%p2110_p13), %v3426_v13  ;;  %v1466_v13 = vld [vmem:[#allocation9 + $0xd0] sm:$0xff] (!%p2110_p13) }
 0x136   : > { %3336 = vmatpush1.bf16.msra.mxu1 (!%p2110_p13), %v3442_v14  ;;  %3306 = vmatprep.subr.bf16.mxu0 (!%p2110_p13), %v3427_v15  ;;  %v1470_v14 = vld [vmem:[#allocation9 + $0xf0] sm:$0xff] (!%p2110_p13)  ;;  %v1467_v15 = vld [vmem:[#allocation9 + $0xd8] sm:$0xff] (!%p2110_p13) }
 0x137   : > { %3338 = vmatprep.subr.bf16.mxu1 (!%p2110_p13), %v3443_v16  ;;  %v1471_v16 = vld [vmem:[#allocation9 + $0xf8] sm:$0xff] (!%p2110_p13) }
 0x19e   : > { %v2789_v17 = vpop.f32.mrb[0].mxu0 }
 0x19f   : > { %v2824_v18 = vpop.f32.mrb[0].mxu1  ;;  %v2790_v19 = vpop.f32.mrb[1].mxu0 }
 0x1a0   : > { %v2825_v20 = vpop.f32.mrb[1].mxu1  ;;  %v2791_v21 = vadd.f32 %v2790_v19, %v2789_v17  ;;  %v1472_v17 = vld [vmem:[#allocation9 + $0x100] sm:$0xff] (!%p2110_p13)  ;;  %v1473_v19 = vld [vmem:[#allocation9 + $0x108] sm:$0xff] (!%p2110_p13) }
 0x1a1   : > { %v2826_v22 = vadd.f32 %v2825_v20, %v2824_v18  ;;  %v1476_v18 = vld [vmem:[#allocation9 + $0x120] sm:$0xff] (!%p2110_p13)  ;;  %v1477_v20 = vld [vmem:[#allocation9 + $0x128] sm:$0xff] (!%p2110_p13) }
 0x1a3   : > { %v1002_v23 = vadd.f32 %v2826_v22, %v2791_v21  ;;  %v3428_v21 = vcombine.low (!%p2110_p13), %v1464_v9, %v1468_v10  ;;  %v3444_v22 = vcombine.low (!%p2110_p13), %v1465_v11, %v1469_v12  ;;  %v3456_v9 = vcombine.low (!%p2110_p13), %v1450_v60, %v1454_v61 }
 0x1a4   : > { %v3472_v10 = vcombine.low (!%p2110_p13), %v1451_v63, %v1455_v0  ;;  %v3457_v11 = vcombine.high (!%p2110_p13), %v1458_v5, %v1462_v6  ;;  %v3473_v12 = vcombine.high (!%p2110_p13), %v1459_v7, %v1463_v8 }
 0x1a5   : > { %3308 = vmatpush1.bf16.msra.mxu0 (!%p2110_p13), %v3428_v21  ;;  %3340 = vmatpush1.bf16.msra.mxu1 (!%p2110_p13), %v3444_v22  ;;  %v1474_v21 = vld [vmem:[#allocation9 + $0x110] sm:$0xff] (!%p2110_p13) }
 0x1a6   : > { %v1478_v22 = vld [vmem:[#allocation9 + $0x130] sm:$0xff] (!%p2110_p13) }
 0x1be   : > { %v2859_v24 = vpop.f32.mrb[2].mxu0 }
 0x1bf   : > { %v2894_v25 = vpop.f32.mrb[2].mxu1  ;;  %v2860_v26 = vpop.f32.mrb[3].mxu0 }
 0x1c0   : > { %v2895_v27 = vpop.f32.mrb[3].mxu1  ;;  %v2861_v28 = vadd.f32 %v2860_v26, %v2859_v24  ;;  %v3445_v24 = vcombine.high (!%p2110_p13), %v1473_v19, %v1477_v20  ;;  %v1484_v26 = vld [vmem:[#allocation9 + $0x160] sm:$0xff] (!%p2110_p13) }
 0x1c1   : > { %v2896_v29 = vadd.f32 %v2895_v27, %v2894_v25  ;;  %v1480_v25 = vld [vmem:[#allocation9 + $0x140] sm:$0xff] (!%p2110_p13)  ;;  %v1481_v27 = vld [vmem:[#allocation9 + $0x148] sm:$0xff] (!%p2110_p13) }
 0x1c2   : > { %v1072_v30 = vadd.f32 %v2861_v28, %v1002_v23  ;;  %v3429_v23 = vcombine.high (!%p2110_p13), %v1472_v17, %v1476_v18  ;;  %v1485_v28 = vld [vmem:[#allocation9 + $0x168] sm:$0xff] (!%p2110_p13)  ;;  %3342 = vmatprep.subr.bf16.mxu1 (!%p2110_p13), %v3445_v24  ;;  %v1479_v24 = vld [vmem:[#allocation9 + $0x138] sm:$0xff] (!%p2110_p13) }
 0x1c4   : > { %v1142_v31 = vadd.f32 %v2896_v29, %v1072_v30  ;;  %v3430_v29 = vcombine.low (!%p2110_p13), %v1472_v17, %v1476_v18  ;;  %3310 = vmatprep.subr.bf16.mxu0 (!%p2110_p13), %v3429_v23  ;;  %v3446_v30 = vcombine.low (!%p2110_p13), %v1473_v19, %v1477_v20  ;;  %v3458_v17 = vcombine.low (!%p2110_p13), %v1458_v5, %v1462_v6  ;;  %v1475_v23 = vld [vmem:[#allocation9 + $0x118] sm:$0xff] (!%p2110_p13) }
 0x1c5   : > { %v3474_v18 = vcombine.low (!%p2110_p13), %v1459_v7, %v1463_v8  ;;  %v3459_v19 = vcombine.high (!%p2110_p13), %v1466_v13, %v1470_v14  ;;  %v3475_v20 = vcombine.high (!%p2110_p13), %v1467_v15, %v1471_v16 }
 0x1c6   : > { %3312 = vmatpush1.bf16.msra.mxu0 (!%p2110_p13), %v3430_v29  ;;  %3344 = vmatpush1.bf16.msra.mxu1 (!%p2110_p13), %v3446_v30  ;;  %v1486_v29 = vld [vmem:[#allocation9 + $0x170] sm:$0xff] (!%p2110_p13)  ;;  %v1483_v30 = vld [vmem:[#allocation9 + $0x158] sm:$0xff] (!%p2110_p13) }
 0x1de   : > { %v2929_v32 = vpop.f32.mrb[4].mxu0 }
 0x1df   : > { %v2964_v33 = vpop.f32.mrb[4].mxu1  ;;  %v2930_v34 = vpop.f32.mrb[5].mxu0 }
 0x1e0   : > { %v2965_v35 = vpop.f32.mrb[5].mxu1  ;;  %v2931_v36 = vadd.f32 %v2930_v34, %v2929_v32  ;;  %v3447_v32 = vcombine.high (!%p2110_p13), %v1481_v27, %v1485_v28  ;;  %v1492_v34 = vld [vmem:[#allocation9 + $0x1a0] sm:$0xff] (!%p2110_p13) }
 0x1e1   : > { %v2966_v37 = vadd.f32 %v2965_v35, %v2964_v33  ;;  %v1488_v33 = vld [vmem:[#allocation9 + $0x180] sm:$0xff] (!%p2110_p13)  ;;  %v1489_v35 = vld [vmem:[#allocation9 + $0x188] sm:$0xff] (!%p2110_p13) }
 0x1e2   : > { %v1212_v38 = vadd.f32 %v2931_v36, %v1142_v31  ;;  %v3431_v31 = vcombine.high (!%p2110_p13), %v1480_v25, %v1484_v26  ;;  %v1493_v36 = vld [vmem:[#allocation9 + $0x1a8] sm:$0xff] (!%p2110_p13)  ;;  %3346 = vmatprep.subr.bf16.mxu1 (!%p2110_p13), %v3447_v32  ;;  %v3462_v32 = vcombine.low (!%p2110_p13), %v1474_v21, %v1478_v22 }
 0x1e4   : > { %v1282_v39 = vadd.f32 %v2966_v37, %v1212_v38  ;;  %v3432_v37 = vcombine.low (!%p2110_p13), %v1480_v25, %v1484_v26  ;;  %3314 = vmatprep.subr.bf16.mxu0 (!%p2110_p13), %v3431_v31  ;;  %v3448_v38 = vcombine.low (!%p2110_p13), %v1481_v27, %v1485_v28  ;;  %v3460_v25 = vcombine.low (!%p2110_p13), %v1466_v13, %v1470_v14  ;;  %v1482_v28 = vld [vmem:[#allocation9 + $0x150] sm:$0xff] (!%p2110_p13)  ;;  %v1487_v31 = vld [vmem:[#allocation9 + $0x178] sm:$0xff] (!%p2110_p13) }
 0x1e5   : > { %v3476_v26 = vcombine.low (!%p2110_p13), %v1467_v15, %v1471_v16  ;;  %v3461_v27 = vcombine.high (!%p2110_p13), %v1474_v21, %v1478_v22 }
 0x1e6   : > { %3316 = vmatpush1.bf16.msra.mxu0 (!%p2110_p13), %v3432_v37  ;;  %3348 = vmatpush1.bf16.msra.mxu1 (!%p2110_p13), %v3448_v38  ;;  %v1494_v37 = vld [vmem:[#allocation9 + $0x1b0] sm:$0xff] (!%p2110_p13)  ;;  %v1491_v38 = vld [vmem:[#allocation9 + $0x198] sm:$0xff] (!%p2110_p13) }
 0x1fe   : > { %v2999_v40 = vpop.f32.mrb[6].mxu0 }
 0x1ff   : > { %v3034_v41 = vpop.f32.mrb[6].mxu1  ;;  %v3000_v42 = vpop.f32.mrb[7].mxu0 }
 0x200   : > { %v3035_v43 = vpop.f32.mrb[7].mxu1  ;;  %v3001_v44 = vadd.f32 %v3000_v42, %v2999_v40  ;;  %v3449_v40 = vcombine.high (!%p2110_p13), %v1489_v35, %v1493_v36  ;;  %v1500_v42 = vld [vmem:[#allocation9 + $0x1e0] sm:$0xff] (!%p2110_p13) }
 0x201   : > { %v3036_v45 = vadd.f32 %v3035_v43, %v3034_v41  ;;  %v1496_v41 = vld [vmem:[#allocation9 + $0x1c0] sm:$0xff] (!%p2110_p13)  ;;  %v1497_v43 = vld [vmem:[#allocation9 + $0x1c8] sm:$0xff] (!%p2110_p13) }
 0x202   : > { %v1352_v46 = vadd.f32 %v3001_v44, %v1282_v39  ;;  %1430 = sbr.rel (%p2110_p13) target bundleno = 778 (0x30a), region = 68  ;;  %v3433_v39 = vcombine.high (!%p2110_p13), %v1488_v33, %v1492_v34  ;;  %v1501_v44 = vld [vmem:[#allocation9 + $0x1e8] sm:$0xff] (!%p2110_p13)  ;;  %3350 = vmatprep.subr.bf16.mxu1 (!%p2110_p13), %v3449_v40  ;;  %v3436_v53 = vcombine.low (!%p2110_p13), %v1496_v41, %v1500_v42  ;;  %v3464_v40 = vcombine.low (!%p2110_p13), %v1482_v28, %v1486_v29 }
 0x203   : > { %v3452_v56 = vcombine.low (!%p2110_p13), %v1497_v43, %v1501_v44 }
 0x204   : > { %v1422_v48 = vadd.f32 %v3036_v45, %v1352_v46  ;;  %v3434_v45 = vcombine.low (!%p2110_p13), %v1488_v33, %v1492_v34  ;;  %3318 = vmatprep.subr.bf16.mxu0 (!%p2110_p13), %v3433_v39  ;;  %v3450_v46 = vcombine.low (!%p2110_p13), %v1489_v35, %v1493_v36  ;;  %v3478_v33 = vcombine.low (!%p2110_p13), %v1475_v23, %v1479_v24  ;;  %v1490_v36 = vld [vmem:[#allocation9 + $0x190] sm:$0xff] (!%p2110_p13)  ;;  %v1495_v39 = vld [vmem:[#allocation9 + $0x1b8] sm:$0xff] (!%p2110_p13) }
 0x205   : > { %v3463_v34 = vcombine.high (!%p2110_p13), %v1482_v28, %v1486_v29  ;;  %v3479_v35 = vcombine.high (!%p2110_p13), %v1483_v30, %v1487_v31 }
 0x206   : > { %v1425_v49 = vadd.f32 %v1422_v48, %v336_v47  ;;  %v3435_v47 = vcombine.high (!%p2110_p13), %v1496_v41, %v1500_v42  ;;  %v3451_v48 = vcombine.high (!%p2110_p13), %v1497_v43, %v1501_v44  ;;  %3320 = vmatpush1.bf16.msra.mxu0 (!%p2110_p13), %v3434_v45  ;;  %3352 = vmatpush1.bf16.msra.mxu1 (!%p2110_p13), %v3450_v46  ;;  %v1498_v44 = vld [vmem:[#allocation9 + $0x1d0] sm:$0xff] (!%p2110_p13)  ;;  %v1499_v46 = vld [vmem:[#allocation9 + $0x1d8] sm:$0xff] (!%p2110_p13) }
 0x207   : > { %v3480_v41 = vcombine.low (!%p2110_p13), %v1483_v30, %v1487_v31  ;;  %v3465_v42 = vcombine.high (!%p2110_p13), %v1490_v36, %v1494_v37  ;;  %v3481_v43 = vcombine.high (!%p2110_p13), %v1491_v38, %v1495_v39  ;;  %v1502_v45 = vld [vmem:[#allocation9 + $0x1f0] sm:$0xff] (!%p2110_p13) }
 0x208   : > { %1426 = vst [vmem:[#allocation2] sm:$0xff] %v1425_v49  ;;  %v1442_v49 = vld [vmem:[#allocation9 + $0x10] sm:$0xff] (!%p2110_p13)  ;;  %3322 = vmatprep.subr.bf16.mxu0 (!%p2110_p13), %v3435_v47  ;;  %3354 = vmatprep.subr.bf16.mxu1 (!%p2110_p13), %v3451_v48  ;;  %v1503_v47 = vld [vmem:[#allocation9 + $0x1f8] sm:$0xff] (!%p2110_p13)  ;;  %v3466_v48 = vcombine.low (!%p2110_p13), %v1490_v36, %v1494_v37  ;;  %v3468_v52 = vcombine.low (!%p2110_p13), %v1498_v44, %v1502_v45 }
 0x209   : > { %v3453_v57 = vcombine.high %v1442_v49, %v1446_v50  ;;  %v3454_v1 = vcombine.low %v1442_v49, %v1446_v50  ;;  %v3482_v49 = vcombine.low %v1491_v38, %v1495_v39  ;;  %v3467_v50 = vcombine.high %v1498_v44, %v1502_v45 }
 0x20a   : > { %3324 = vmatpush1.bf16.msra.mxu0 %v3436_v53  ;;  %3356 = vmatpush1.bf16.msra.mxu1 %v3452_v56  ;;  %v3483_v51 = vcombine.high %v1499_v46, %v1503_v47  ;;  %v3484_v53 = vcombine.low %v1499_v46, %v1503_v47 }
 0x20b   : > { %3358 = vmatprep.subr.bf16.mxu0 %v3453_v57  ;;  %3390 = vmatprep.subr.bf16.mxu1 %v3469_v59  ;;  %v1632_v57 = vld [vmem:[#allocation11] sm:$0xff] }
 0x20f   : > { %v1431_v54 = vld [vmem:[#allocation2] sm:$0xff] }
 0x210   : > { %v4264_v62 = vadd.f32 %v2111_v55, %v1431_v54  ;;  %v1634_v54 = vlaneseq }
 0x212   : > { %1739 = vmatmul.mubr.f32.vlgmr.msra.gmra.mrb[0].mxu0 %v4264_v62  ;;  %1810 = vmatmul.mubr.f32.vlgmr.msra.gmra.mrb[0].mxu1 %v4264_v62  ;;  %v1635_v55 = vshrl.u32 %v1634_v54, 7 }
 0x213   : > { %3360 = vmatpush1.bf16.msra.mxu0 %v3454_v1  ;;  %3392 = vmatpush1.bf16.msra.mxu1 %v3470_v2 }
 0x214   : > { %3362 = vmatprep.subr.bf16.mxu0 %v3455_v3  ;;  %3394 = vmatprep.subr.bf16.mxu1 %v3471_v4  ;;  %v1636_v56 = vsub.s32 0, %v1635_v55  ;;  %v1644_v59 = vsub.s32 2, %v1635_v55  ;;  %v1640_v60 = vsub.s32 1, %v1635_v55  ;;  %v1648_v61 = vsub.s32 3, %v1635_v55 }
 0x215   : > { %1880 = vmatprep.mubr.f32.mxu0 %v3837_v58  ;;  %1951 = vmatprep.mubr.f32.mxu1 %v3837_v58  ;;  %v3477_v58 = vcombine.high %v1475_v23, %v1479_v24  ;;  %v1664_v13 = vsub.s32 7, %v1635_v55 }
 0x216   : > { %v1637_v63 = vrot.slane %v1632_v57, %v1636_v56  ;;  %v1645_v0 = vrot.slane %v1632_v57, %v1644_v59  ;;  %v1641_v1 = vrot.slane %v1632_v57, %v1640_v60  ;;  %v1649_v2 = vrot.slane %v1632_v57, %v1648_v61 }
 0x217   : > { %3364 = vmatpush1.bf16.msra.mxu0 %v3456_v9  ;;  %3396 = vmatpush1.bf16.msra.mxu1 %v3472_v10  ;;  %v1652_v10 = vsub.s32 4, %v1635_v55 }
 0x218   : > { %3366 = vmatprep.subr.bf16.mxu0 %v3457_v11  ;;  %3398 = vmatprep.subr.bf16.mxu1 %v3473_v12  ;;  %v1660_v11 = vsub.s32 6, %v1635_v55  ;;  %v1656_v12 = vsub.s32 5, %v1635_v55 }
 0x219   : > { %v1653_v14 = vrot.slane %v1632_v57, %v1652_v10 }
 0x21a   : > { %v1661_v15 = vrot.slane %v1632_v57, %v1660_v11  ;;  %v1657_v16 = vrot.slane %v1632_v57, %v1656_v12 }
 0x21b   : > { %3368 = vmatpush1.bf16.msra.mxu0 %v3458_v17  ;;  %3400 = vmatpush1.bf16.msra.mxu1 %v3474_v18  ;;  %v1665_v17 = vrot.slane %v1632_v57, %v1664_v13 }
 0x21c   : > { %3370 = vmatprep.subr.bf16.mxu0 %v3459_v19  ;;  %3402 = vmatprep.subr.bf16.mxu1 %v3475_v20 }
 0x21f   : > { %3372 = vmatpush1.bf16.msra.mxu0 %v3460_v25  ;;  %3404 = vmatpush1.bf16.msra.mxu1 %v3476_v26 }
 0x220   : > { %3374 = vmatprep.subr.bf16.mxu0 %v3461_v27  ;;  %3406 = vmatprep.subr.bf16.mxu1 %v3477_v58 }
 0x223   : > { %3376 = vmatpush1.bf16.msra.mxu0 %v3462_v32  ;;  %3408 = vmatpush1.bf16.msra.mxu1 %v3478_v33 }
 0x224   : > { %3378 = vmatprep.subr.bf16.mxu0 %v3463_v34  ;;  %3410 = vmatprep.subr.bf16.mxu1 %v3479_v35 }
 0x227   : > { %3380 = vmatpush1.bf16.msra.mxu0 %v3464_v40  ;;  %3412 = vmatpush1.bf16.msra.mxu1 %v3480_v41 }
 0x228   : > { %3382 = vmatprep.subr.bf16.mxu0 %v3465_v42  ;;  %3414 = vmatprep.subr.bf16.mxu1 %v3481_v43 }
 0x22b   : > { %3384 = vmatpush1.bf16.msra.mxu0 %v3466_v48  ;;  %3416 = vmatpush1.bf16.msra.mxu1 %v3482_v49 }
 0x22c   : > { %3386 = vmatprep.subr.bf16.mxu0 %v3467_v50  ;;  %3418 = vmatprep.subr.bf16.mxu1 %v3483_v51 }
 0x22f   : > { %3388 = vmatpush1.bf16.msra.mxu0 %v3468_v52  ;;  %3420 = vmatpush1.bf16.msra.mxu1 %v3484_v53 }
 0x232   : > { %1881 = vmatmul.mubr.f32.vlgmr.msra.gmra.mrb[2].mxu0 %v4264_v62  ;;  %1952 = vmatmul.mubr.f32.vlgmr.msra.gmra.mrb[2].mxu1 %v4264_v62 }
 0x2e5   : > { %v1740_v3 = vpop.f32.mrb[0].mxu0  ;;  %v1811_v5 = vpop.f32.mrb[0].mxu1 }
 0x2e6   : > { %v1741_v4 = vadd.f32 %v1740_v3, %v1637_v63  ;;  %v1742_v6 = vpop.f32.mrb[1].mxu0  ;;  %v1812_v7 = vadd.f32 %v1811_v5, %v1645_v0  ;;  %v1813_v9 = vpop.f32.mrb[1].mxu1 }
 0x2e7   : > { %v1743_v8 = vadd.f32 %v1742_v6, %v1641_v1  ;;  %v1814_v62 = vadd.f32 %v1813_v9, %v1649_v2 }
 0x2e8   : > { %1958 = vst [vmem:[#allocation12] sm:$0xff] %v1741_v4  ;;  %1960 = vst [vmem:[#allocation12 + $0x10] sm:$0xff] %v1812_v7 }
 0x2e9   : > { %1959 = vst [vmem:[#allocation12 + $0x8] sm:$0xff] %v1743_v8  ;;  %1961 = vst [vmem:[#allocation12 + $0x18] sm:$0xff] %v1814_v62 }
 0x305   : > { %v1882_v18 = vpop.f32.mrb[2].mxu0  ;;  %v1953_v20 = vpop.f32.mrb[2].mxu1 }
 0x306   : > { %v1883_v19 = vadd.f32 %v1882_v18, %v1653_v14  ;;  %v1884_v21 = vpop.f32.mrb[3].mxu0  ;;  %v1954_v22 = vadd.f32 %v1953_v20, %v1661_v15  ;;  %v1955_v24 = vpop.f32.mrb[3].mxu1 }
 0x307   : > { %v1885_v23 = vadd.f32 %v1884_v21, %v1657_v16  ;;  %v1956_v25 = vadd.f32 %v1955_v24, %v1665_v17 }
 0x308   : > { %1962 = vst [vmem:[#allocation12 + $0x20] sm:$0xff] %v1883_v19  ;;  %1964 = vst [vmem:[#allocation12 + $0x30] sm:$0xff] %v1954_v22 }
 0x309   : > { %1963 = vst [vmem:[#allocation12 + $0x28] sm:$0xff] %v1885_v23  ;;  %1965 = vst [vmem:[#allocation12 + $0x38] sm:$0xff] %v1956_v25 }
 0x30a PF: > { %p3529_p2 = scmp.eq.s32.totalorder %s3898_s24, 4  ;;  %s3838_s21 = smov [#allocation12]  }
 0x30b   : > { %s1976_s25 = sshll.u32 %s3838_s21, 4  ;;  %s1977_s25 = int_to_ptr.vmem [resolvable:$true] %s1976_s25 }
 0x30c   : > { %s3733_s26 = scalar_lea.vmem %s1977_s25, 1024  ;;  %p3740_p8 = scmp.lt.s32.totalorder %s1977_s25, %s1977_s25 }
 0x30d   : > { %p3734_p3 = scmp.ne.s32.totalorder %s1977_s25, %s3733_s26  ;;  %p3741_p10 = scmp.lt.s32.totalorder %s3733_s26, %s3733_s26 }
 0x30f   : > { %p3735_p0 = pnand %p3734_p3, %p3529_p2  ;;  %p3742_p12 = por %p3741_p10, %p3740_p8 }
 0x311   : > { %p3736_p6 = pneg %p3735_p0 }
 0x313   : > { %p3743_p9 = pnand %p3742_p12, %p3736_p6 }
 0x315   : > { %3746 = shalt.err (!%p3743_p9)
}
 0x316   : > { %s3747_s18 = scalar_lea.hbm %s4318_s5, 1024 }
 0x317   : > { %p3748_p5 = scmp.ne.s32.totalorder %s4318_s5, %s3747_s18  ;;  %p3753_p7 = scmp.lt.u32.totalorder %s3747_s18, %s4318_s5 }
 0x319   : > { %p3749_p1 = pnand %p3748_p5, %p3529_p2 }
 0x31b   : > { %p3750_p4 = pneg %p3749_p1 }
 0x31d   : > { %p3755_p11 = pnand %p3753_p7, %p3750_p4 }
 0x31f   : > { %3758 = shalt.err (!%p3755_p11)
}
 0x320   : > { %3502 = dma.vmem_to_hbm [thread:$0]  (%p3529_p2), %s1977_s25, 1024, %s4318_s5, [#allocation5]  }
 0x321   : > { %3800 = dma.done.wait (%p3529_p2), [#allocation5], 1024  }
 0x322   : > { %3802 = vsyncadd (%p3529_p2), [#allocation5], 4294966272 }
 0x323 PF: > { %s23_s23 = sadd.s32 1, %s3825_s23   ;;  %s4333_s18 = smov %s3809_s19 }
 0x324   : > { %p20_p13 = scmp.ge.s32.totalorder %s23_s23, 7   ;;  %s4334_s19 = smov %s3813_s20 }
 0x325   : > { %s4335_s20 = smov %s4008_s7  ;;  %s4336_s21 = smov %s3821_s22 }
 0x326   : > { %s4337_s22 = smov %s4339_s16  ;;  %22 = sbr.rel (!%p20_p13) target bundleno = 8 (0x8), region = 111 }
 0x32d   :  { %1989 = vsyncpa [#allocation4], 1 }
 0x32e   :  { %1991 = vsyncpa [#allocation4 + $0x1], 1 }
 0x32f   :  { %1992 = vsyncpa [#allocation7], 1 }
 0x330   :  { %1994 = vsyncpa [#allocation7 + $0x1], 1 }
 0x331   :  { %1995 = vsyncpa [#allocation10], 1 }
 0x332   :  { %1996 = vsyncpa [#allocation5], 1 }
 0x333   :  { %1998 = vsyncpa [#allocation5 + $0x1], 1 }

</bundles_post_ra>
